<compile_context>
chip_gen: v6e
topology: v6e:2x2x1
jax: 0.10.0
libtpu: 0.0.40
codegen_flags: <defaults>
</compile_context>

<pallas_src>
import numpy as np
import jax
import jax.numpy as jnp
from jax import lax
from jax.experimental import pallas as pl
from jax.experimental.pallas import tpu as pltpu

SEQ_LEN = 128          # L, full lane axis of every block (do NOT tile along L)
BATCH = 16             # B sequences in the test
CENTERS_SHAPE = (2, 16)

# TODO(synk): real assign_motif_probs uses ambiguity-aware regexes + anchors on
# a character sequence; here motifs are fixed exact integer-token patterns
# (A,C,G,T -> 0..3) matched on-device with rolled, base-8-packed token codes.
MOTIF_PATTERNS = (
    (0,),            # "A"
    (3,),            # "T"
    (0, 1),          # "AC"
    (2, 3),          # "GT"
    (1, 1),          # "CC"
    (0, 2, 0),       # "AGA"
    (3, 0, 3),       # "TAT"
    (2, 2, 1),       # "GGC"
)
N_MOTIFS = len(MOTIF_PATTERNS)
MAX_PAT_LEN = max(len(p) for p in MOTIF_PATTERNS)

BITS_PER_TOK = 3       # 3 bits/token so an impossible "poison" token (4) exists
POISON_TOKEN = 4       # never equals a real token 0..3 in any 3-bit slot

_MAX_BATCH_TILE = 512  # rows per grid step for large batches (~0.5 MiB dbl-buffered)


# ----------------------------------------------------------------------------
# Pallas kernel: on-device motif matching + per-sequence normalize + scale
# ----------------------------------------------------------------------------
def mmr_kernel(seq_ref, prob_ref, centers_ref, out_ref):
    """seq_ref: (Bt, L) int8 VMEM; prob_ref: (M,) f32 SMEM;
       centers_ref: (1,) f32 SMEM; out_ref: (Bt, L) f32 VMEM."""
    bt, L = out_ref.shape
    s0 = seq_ref[...].astype(jnp.int32)                      # widen int8 once
    lane = lax.broadcasted_iota(jnp.int32, (bt, L), 1)

    # shifted[k][b, l] == seq[b, l + k]; wrap-around tail lanes poisoned once
    # with an impossible token (2 selects total, no per-motif tail masks).
    shifted = [s0]
    for k in range(1, MAX_PAT_LEN):
        sk = pltpu.roll(s0, shift=L - k, axis=1)              # XLU left-rotate by k
        sk = jnp.where(lane >= L - k, POISON_TOKEN, sk)
        shifted.append(sk)

    # Base-8 packed k-gram code: bits [3k : 3k+3] = token at position l+k.
    code = shifted[0]
    for k in range(1, MAX_PAT_LEN):
        code = code | (shifted[k] << (BITS_PER_TOK * k))

    # pos[b, l] = sum_m prob[m] * (motif m matches at position l)   (pure VPU)
    pos = jnp.zeros((bt, L), jnp.float32)
    for m, pat in enumerate(MOTIF_PATTERNS):
        pat_code = 0
        for i, tok in enumerate(pat):
            pat_code |= tok << (BITS_PER_TOK * i)
        if len(pat) == MAX_PAT_LEN:
            match = code == pat_code                           # mask not needed
        else:
            mask = (1 << (BITS_PER_TOK * len(pat))) - 1
            match = (code & mask) == pat_code
        pos = pos + jnp.where(match, prob_ref[m], 0.0)

    # Per-sequence normalization, then scale by sum(mmr_centers_probs).
    totals = jnp.sum(pos, axis=-1, keepdims=True)              # (Bt, 1) XLU reduce
    safe = jnp.where(totals > 0.0, totals, 1.0)                 # guard all-zero rows
    out_ref[...] = pos * (centers_ref[0] / safe)                # exact divide, (Bt,1)


# ----------------------------------------------------------------------------
# Wrapper
# ----------------------------------------------------------------------------
def _pick_batch_tile(B):
    """B is a multiple of 8. Single block for small B (amortize per-step cost);
    for big B keep >=2 grid steps so the 'parallel' axis can shard across TCs."""
    if B <= _MAX_BATCH_TILE:
        return B
    cap = min(_MAX_BATCH_TILE, B // 2)
    for step in (32, 8):                     # prefer int8 sublane-dense tiles
        for bt in range(cap - cap % step, step - 1, -step):
            if B % bt == 0:
                return bt
    return B


@jax.jit
def mismatch_repair_forward(seq_tokens, motifs_prob, mmr_centers_probs):
    """seq_tokens: (B, L) int tokens 0..3; motifs_prob: (M,) f32;
       mmr_centers_probs: f32 array of any shape."""
    B, L = seq_tokens.shape
    Bp = ((B + 7) // 8) * 8                  # pad batch to sublane multiple
    if Bp != B:
        seq_tokens = jnp.pad(seq_tokens, ((0, Bp - B), (0, 0)))
    bt = _pick_batch_tile(Bp)

    # Hoisted reduction: XLA fuses it; kernel gets a single SMEM scalar.
    centers_sum = jnp.sum(mmr_centers_probs, dtype=jnp.float32).reshape(1)
    seq_i8 = seq_tokens.astype(jnp.int8)     # tokens fit in int8 -> 1/4 input bytes

    out = pl.pallas_call(
        mmr_kernel,
        out_shape=jax.ShapeDtypeStruct((Bp, L), jnp.float32),
        grid=(Bp // bt,),
        in_specs=[
            pl.BlockSpec((bt, L), lambda b: (b, 0)),
            pl.BlockSpec(memory_space=pltpu.MemorySpace.SMEM),
            pl.BlockSpec(memory_space=pltpu.MemorySpace.SMEM),
        ],
        out_specs=pl.BlockSpec((bt, L), lambda b: (b, 0)),
        compiler_params=pltpu.CompilerParams(
            dimension_semantics=("parallel",)),
    )(seq_i8, motifs_prob.astype(jnp.float32), centers_sum)
    return out[:B]


# ----------------------------------------------------------------------------
# Test
# ----------------------------------------------------------------------------
if __name__ == "__main__":
    key = jax.random.PRNGKey(0)
    k_seq, k_centers = jax.random.split(key)

    # Batch of integer-tokenized DNA sequences (A,C,G,T -> 0..3).
    seq_tokens = jax.random.randint(k_seq, (BATCH, SEQ_LEN), 0, 4, dtype=jnp.int32)
    mmr_centers_probs = jax.random.uniform(k_centers, CENTERS_SHAPE, dtype=jnp.float32)
    # nn.Parameter(normalize(torch.ones(len(motifs)))) -> uniform 1/M.
    motifs_prob = jnp.full((N_MOTIFS,), 1.0 / N_MOTIFS, dtype=jnp.float32)

    out = mismatch_repair_forward(seq_tokens, motifs_prob, mmr_centers_probs)
    out = jax.block_until_ready(out)

    # Plain NumPy reference of the same semantics (host-side pattern matching).
    seq_np = np.asarray(seq_tokens)
    prob_np = np.asarray(motifs_prob)
    match = np.zeros((BATCH, N_MOTIFS, SEQ_LEN), dtype=np.float32)
    for b in range(BATCH):
        for m, pat in enumerate(MOTIF_PATTERNS):
            kp = len(pat)
            for l in range(SEQ_LEN - kp + 1):
                if np.array_equal(seq_np[b, l:l + kp], np.asarray(pat)):
                    match[b, m, l] = 1.0
    pos_ref = np.einsum("m,bml->bl", prob_np, match)
    ref = (pos_ref / pos_ref.sum(axis=1, keepdims=True)
           * float(np.asarray(mmr_centers_probs).sum()))

    np.testing.assert_allclose(np.asarray(out), ref, rtol=1e-4, atol=1e-6)
    print("KERNEL_OK")
</pallas_src>

<mosaic_0001>
module attributes {stable_mosaic.version = 11 : i64} {
  func.func @mmr_kernel(%arg0: i32, %arg1: memref<16x128xi8, #tpu.memory_space<vmem>>, %arg2: memref<8xf32, #tpu.memory_space<smem>>, %arg3: memref<1xf32, #tpu.memory_space<smem>>, %arg4: memref<16x128xf32, #tpu.memory_space<vmem>>) attributes {dimension_semantics = [#tpu.dimension_semantics<parallel>], iteration_bounds = array<i64: 1>, scalar_prefetch = 0 : i64, scratch_operands = 0 : i64, tpu.core_type = #tpu.core_type<tc>, window_params = [{transform_indices = @transform_0, window_bounds = array<i64: 16, 128>}, {transform_indices = @transform_1, window_bounds = array<i64: 8>}, {transform_indices = @transform_2, window_bounds = array<i64: 1>}, {transform_indices = @transform_3, window_bounds = array<i64: 16, 128>}]} {
    %c0 = arith.constant 0 : index
    %c0_0 = arith.constant 0 : index
    %0 = vector.load %arg1[%c0, %c0_0] : memref<16x128xi8, #tpu.memory_space<vmem>>, vector<16x128xi8>
    %1 = arith.extsi %0 : vector<16x128xi8> to vector<16x128xi32>
    %2 = tpu.iota {dimensions = array<i32: 1>} : vector<16x128xi32>
    %c127_i32 = arith.constant 127 : i32
    %3 = tpu.dynamic_rotate %1 by %c127_i32 dim 1 : vector<16x128xi32>, i32 -> vector<16x128xi32>
    %c127_i32_1 = arith.constant 127 : i32
    %4 = vector.broadcast %c127_i32_1 : i32 to vector<16x128xi32>
    %5 = arith.cmpi sge, %2, %4 : vector<16x128xi32>
    %c4_i32 = arith.constant 4 : i32
    %6 = vector.broadcast %c4_i32 : i32 to vector<16x128xi32>
    %7 = arith.select %5, %6, %3 : vector<16x128xi1>, vector<16x128xi32>
    %c126_i32 = arith.constant 126 : i32
    %8 = tpu.dynamic_rotate %1 by %c126_i32 dim 1 : vector<16x128xi32>, i32 -> vector<16x128xi32>
    %c126_i32_2 = arith.constant 126 : i32
    %9 = vector.broadcast %c126_i32_2 : i32 to vector<16x128xi32>
    %10 = arith.cmpi sge, %2, %9 : vector<16x128xi32>
    %c4_i32_3 = arith.constant 4 : i32
    %11 = vector.broadcast %c4_i32_3 : i32 to vector<16x128xi32>
    %12 = arith.select %10, %11, %8 : vector<16x128xi1>, vector<16x128xi32>
    %c3_i32 = arith.constant 3 : i32
    %13 = vector.broadcast %c3_i32 : i32 to vector<16x128xi32>
    %14 = arith.shli %7, %13 : vector<16x128xi32>
    %15 = arith.ori %1, %14 : vector<16x128xi32>
    %c6_i32 = arith.constant 6 : i32
    %16 = vector.broadcast %c6_i32 : i32 to vector<16x128xi32>
    %17 = arith.shli %12, %16 : vector<16x128xi32>
    %18 = arith.ori %15, %17 : vector<16x128xi32>
    %cst = arith.constant 0.000000e+00 : f32
    %19 = vector.broadcast %cst : f32 to vector<16x128xf32>
    %c7_i32 = arith.constant 7 : i32
    %20 = vector.broadcast %c7_i32 : i32 to vector<16x128xi32>
    %21 = arith.andi %18, %20 : vector<16x128xi32>
    %c0_i32 = arith.constant 0 : i32
    %22 = vector.broadcast %c0_i32 : i32 to vector<16x128xi32>
    %23 = arith.cmpi eq, %21, %22 : vector<16x128xi32>
    %c0_4 = arith.constant 0 : index
    %24 = memref.load %arg2[%c0_4] : memref<8xf32, #tpu.memory_space<smem>>
    %cst_5 = arith.constant 0.000000e+00 : f32
    %25 = vector.broadcast %24 : f32 to vector<16x128xf32>
    %26 = vector.broadcast %cst_5 : f32 to vector<16x128xf32>
    %27 = arith.select %23, %25, %26 : vector<16x128xi1>, vector<16x128xf32>
    %28 = arith.addf %19, %27 : vector<16x128xf32>
    %c7_i32_6 = arith.constant 7 : i32
    %29 = vector.broadcast %c7_i32_6 : i32 to vector<16x128xi32>
    %30 = arith.andi %18, %29 : vector<16x128xi32>
    %c3_i32_7 = arith.constant 3 : i32
    %31 = vector.broadcast %c3_i32_7 : i32 to vector<16x128xi32>
    %32 = arith.cmpi eq, %30, %31 : vector<16x128xi32>
    %c1 = arith.constant 1 : index
    %33 = memref.load %arg2[%c1] : memref<8xf32, #tpu.memory_space<smem>>
    %cst_8 = arith.constant 0.000000e+00 : f32
    %34 = vector.broadcast %33 : f32 to vector<16x128xf32>
    %35 = vector.broadcast %cst_8 : f32 to vector<16x128xf32>
    %36 = arith.select %32, %34, %35 : vector<16x128xi1>, vector<16x128xf32>
    %37 = arith.addf %28, %36 : vector<16x128xf32>
    %c63_i32 = arith.constant 63 : i32
    %38 = vector.broadcast %c63_i32 : i32 to vector<16x128xi32>
    %39 = arith.andi %18, %38 : vector<16x128xi32>
    %c8_i32 = arith.constant 8 : i32
    %40 = vector.broadcast %c8_i32 : i32 to vector<16x128xi32>
    %41 = arith.cmpi eq, %39, %40 : vector<16x128xi32>
    %c2 = arith.constant 2 : index
    %42 = memref.load %arg2[%c2] : memref<8xf32, #tpu.memory_space<smem>>
    %cst_9 = arith.constant 0.000000e+00 : f32
    %43 = vector.broadcast %42 : f32 to vector<16x128xf32>
    %44 = vector.broadcast %cst_9 : f32 to vector<16x128xf32>
    %45 = arith.select %41, %43, %44 : vector<16x128xi1>, vector<16x128xf32>
    %46 = arith.addf %37, %45 : vector<16x128xf32>
    %c63_i32_10 = arith.constant 63 : i32
    %47 = vector.broadcast %c63_i32_10 : i32 to vector<16x128xi32>
    %48 = arith.andi %18, %47 : vector<16x128xi32>
    %c26_i32 = arith.constant 26 : i32
    %49 = vector.broadcast %c26_i32 : i32 to vector<16x128xi32>
    %50 = arith.cmpi eq, %48, %49 : vector<16x128xi32>
    %c3 = arith.constant 3 : index
    %51 = memref.load %arg2[%c3] : memref<8xf32, #tpu.memory_space<smem>>
    %cst_11 = arith.constant 0.000000e+00 : f32
    %52 = vector.broadcast %51 : f32 to vector<16x128xf32>
    %53 = vector.broadcast %cst_11 : f32 to vector<16x128xf32>
    %54 = arith.select %50, %52, %53 : vector<16x128xi1>, vector<16x128xf32>
    %55 = arith.addf %46, %54 : vector<16x128xf32>
    %c63_i32_12 = arith.constant 63 : i32
    %56 = vector.broadcast %c63_i32_12 : i32 to vector<16x128xi32>
    %57 = arith.andi %18, %56 : vector<16x128xi32>
    %c9_i32 = arith.constant 9 : i32
    %58 = vector.broadcast %c9_i32 : i32 to vector<16x128xi32>
    %59 = arith.cmpi eq, %57, %58 : vector<16x128xi32>
    %c4 = arith.constant 4 : index
    %60 = memref.load %arg2[%c4] : memref<8xf32, #tpu.memory_space<smem>>
    %cst_13 = arith.constant 0.000000e+00 : f32
    %61 = vector.broadcast %60 : f32 to vector<16x128xf32>
    %62 = vector.broadcast %cst_13 : f32 to vector<16x128xf32>
    %63 = arith.select %59, %61, %62 : vector<16x128xi1>, vector<16x128xf32>
    %64 = arith.addf %55, %63 : vector<16x128xf32>
    %c16_i32 = arith.constant 16 : i32
    %65 = vector.broadcast %c16_i32 : i32 to vector<16x128xi32>
    %66 = arith.cmpi eq, %18, %65 : vector<16x128xi32>
    %c5 = arith.constant 5 : index
    %67 = memref.load %arg2[%c5] : memref<8xf32, #tpu.memory_space<smem>>
    %cst_14 = arith.constant 0.000000e+00 : f32
    %68 = vector.broadcast %67 : f32 to vector<16x128xf32>
    %69 = vector.broadcast %cst_14 : f32 to vector<16x128xf32>
    %70 = arith.select %66, %68, %69 : vector<16x128xi1>, vector<16x128xf32>
    %71 = arith.addf %64, %70 : vector<16x128xf32>
    %c195_i32 = arith.constant 195 : i32
    %72 = vector.broadcast %c195_i32 : i32 to vector<16x128xi32>
    %73 = arith.cmpi eq, %18, %72 : vector<16x128xi32>
    %c6 = arith.constant 6 : index
    %74 = memref.load %arg2[%c6] : memref<8xf32, #tpu.memory_space<smem>>
    %cst_15 = arith.constant 0.000000e+00 : f32
    %75 = vector.broadcast %74 : f32 to vector<16x128xf32>
    %76 = vector.broadcast %cst_15 : f32 to vector<16x128xf32>
    %77 = arith.select %73, %75, %76 : vector<16x128xi1>, vector<16x128xf32>
    %78 = arith.addf %71, %77 : vector<16x128xf32>
    %c82_i32 = arith.constant 82 : i32
    %79 = vector.broadcast %c82_i32 : i32 to vector<16x128xi32>
    %80 = arith.cmpi eq, %18, %79 : vector<16x128xi32>
    %c7 = arith.constant 7 : index
    %81 = memref.load %arg2[%c7] : memref<8xf32, #tpu.memory_space<smem>>
    %cst_16 = arith.constant 0.000000e+00 : f32
    %82 = vector.broadcast %81 : f32 to vector<16x128xf32>
    %83 = vector.broadcast %cst_16 : f32 to vector<16x128xf32>
    %84 = arith.select %80, %82, %83 : vector<16x128xi1>, vector<16x128xf32>
    %85 = arith.addf %78, %84 : vector<16x128xf32>
    %cst_17 = arith.constant dense<0.000000e+00> : vector<16xf32>
    %86 = vector.multi_reduction <add>, %85, %cst_17 [1] : vector<16x128xf32> to vector<16xf32>
    %87 = vector.shape_cast %86 : vector<16xf32> to vector<16x1xf32>
    %cst_18 = arith.constant 0.000000e+00 : f32
    %88 = vector.broadcast %cst_18 : f32 to vector<16x1xf32>
    %89 = arith.cmpf ogt, %87, %88 : vector<16x1xf32>
    %cst_19 = arith.constant 1.000000e+00 : f32
    %90 = vector.broadcast %cst_19 : f32 to vector<16x1xf32>
    %91 = arith.select %89, %87, %90 : vector<16x1xi1>, vector<16x1xf32>
    %c0_20 = arith.constant 0 : index
    %92 = memref.load %arg3[%c0_20] : memref<1xf32, #tpu.memory_space<smem>>
    %93 = vector.broadcast %92 : f32 to vector<16x1xf32>
    %94 = arith.divf %93, %91 : vector<16x1xf32>
    %95 = vector.broadcast %94 : vector<16x1xf32> to vector<16x128xf32>
    %96 = arith.mulf %85, %95 : vector<16x128xf32>
    %c0_21 = arith.constant 0 : index
    %c0_22 = arith.constant 0 : index
    %97 = vector.load %arg4[%c0_21, %c0_22] : memref<16x128xf32, #tpu.memory_space<vmem>>, vector<16x128xf32>
    tpu.vector_store %arg4[%c0_21, %c0_22], %96 {strides = array<i32>} : memref<16x128xf32, #tpu.memory_space<vmem>>, vector<16x128xf32>,
    return
  }
  func.func @transform_0(%arg0: i32) -> (i32, i32) {
    %c0_i32 = arith.constant 0 : i32
    %c0_i32_0 = arith.constant 0 : i32
    return %arg0, %c0_i32 : i32, i32
  }
  func.func @transform_1(%arg0: i32) -> i32 {
    %c0_i32 = arith.constant 0 : i32
    %c0_i32_0 = arith.constant 0 : i32
    return %c0_i32 : i32
  }
  func.func @transform_2(%arg0: i32) -> i32 {
    %c0_i32 = arith.constant 0 : i32
    %c0_i32_0 = arith.constant 0 : i32
    return %c0_i32 : i32
  }
  func.func @transform_3(%arg0: i32) -> (i32, i32) {
    %c0_i32 = arith.constant 0 : i32
    %c0_i32_0 = arith.constant 0 : i32
    return %arg0, %c0_i32 : i32, i32
  }
}

</mosaic_0001>

<bundles_post_ra>
// kernel: mismatch_repair_forward.1
= control target key start
LH: loop header
LB: loop body
LE: loop exit
PB: predicated region body
PF: predicated region fallthrough
CT: control target
= control target key end

     0   :  { %9 = vsyncpa [#allocation5], 0  ;;  %s283_s0 = inlined_call_operand.vmem [shape: s8[16,128], index: 0, kind: input, shape index: {}]   ;;  %s284_s1 = inlined_call_operand.vmem [shape: f32[8], index: 1, kind: input, shape index: {}]   ;;  %s285_s2 = inlined_call_operand.<no memory space> [shape: f32[1], index: 2, kind: input, shape index: {}]   ;;  %s286_s3 = inlined_call_operand.hbm [shape: f32[16,128], index: 3, kind: output, shape index: {}]  }
   0x1   :  { %10 = vsyncpa [#allocation4], 0  ;;  %s19_s14 = sshll.u32 %s284_s1, 4  ;;  %s20_s14 = int_to_ptr.vmem [resolvable:$true] %s19_s14 }
   0x2   :  { %s181_s15 = scalar_lea.vmem %s20_s14, 16  ;;  %p186_p1 = scmp.lt.s32.totalorder %s20_s14, %s20_s14 }
   0x3   :  { %p182_p0 = scmp.ne.s32.totalorder %s20_s14, %s181_s15  ;;  %p187_p2 = scmp.lt.s32.totalorder %s181_s15, %s181_s15 }
   0x5   :  { %p188_p3 = por %p187_p2, %p186_p1 }
   0x7   :  { %p189_p4 = pnand %p188_p3, %p182_p0 }
   0x9   :  { %192 = shalt.err (!%p189_p4)
}
   0xa   :  { %s217_s16 = smov [#allocation3]  }
   0xb   :  { %22 = dma.vmem_to_smem %s20_s14, 16, %s217_s16, [#allocation5]  }
   0xc   :  { %213 = dma.done.wait [#allocation5], 16  }
   0xd   :  { %214 = vsyncadd [#allocation5], 4294967280 }
   0xe   :  { %28 = sfence }
   0xf   :  { %v168_v0 = vld [vmem:[%s283_s0] sm:$0xf]   ;;  %s218_s19 = smov 127   ;;  %s219_s1 = smov 126   ;;  %v33_v3 = vlaneseq }
  0x10   :  { %v169_v1 = vunpack.c.0.s8 %v168_v0  ;;  %v170_v2 = vunpack.c.1.s8 %v168_v0  ;;  %s249_s20 = sld [smem:[#allocation3]]  ;;  %s220_s29 = smov [#allocation6]  }
  0x11   :  { %v34_v4 = vand.u32 127, %v33_v3  ;;  %s251_s21 = sld [smem:[#allocation3 + $0x1]]  ;;  %v134_v3 = vstv %s285_s2  ;;  %s148_s30 = sshll.u32 %s220_s29, 4  ;;  %s149_s30 = int_to_ptr.vmem [resolvable:$true] %s148_s30 }
  0x12   :  { %35 = vrot.lane.b32.xlu0 %v169_v1, %s218_s19  ;;  %42 = vrot.lane.b32.xlu1 %v169_v1, %s219_s1  ;;  %s255_s0 = sld [smem:[#allocation3 + $0x2]]  ;;  %s193_s4 = scalar_lea.vmem %s149_s30, 256 }
  0x13   :  { %vm39_vm0 = vcmp.ge.s32.totalorder %v34_v4, 127  ;;  %vm46_vm1 = vcmp.ge.s32.totalorder %v34_v4, 126  ;;  %s257_s22 = sld [smem:[#allocation3 + $0x3]]  ;;  %p194_p5 = scmp.ne.s32.totalorder %s149_s30, %s193_s4 }
  0x14   :  { %s259_s23 = sld [smem:[#allocation3 + $0x4]]  ;;  %p198_p6 = scmp.lt.s32.totalorder %s149_s30, %s149_s30 }
  0x15   :  { %s263_s24 = sld [smem:[#allocation3 + $0x5]]  ;;  %p199_p7 = scmp.lt.s32.totalorder %s193_s4, %s193_s4 }
  0x16   :  { %37 = vrot.lane.b32.xlu0 %v170_v2, %s218_s19  ;;  %44 = vrot.lane.b32.xlu1 %v170_v2, %s219_s1  ;;  %v62_v19 = vstv %s249_s20  ;;  %s268_s25 = sld [smem:[#allocation3 + $0x6]] }
  0x17   :  { %v70_v22 = vstv %s251_s21  ;;  %s270_s26 = sld [smem:[#allocation3 + $0x7]]  ;;  %p200_p8 = por %p199_p7, %p198_p6 }
  0x18   :  { %v80_v24 = vstv %s255_s0 }
  0x19   :  { %v88_v30 = vstv %s257_s22  ;;  %p201_p9 = pnand %p200_p8, %p194_p5 }
  0x1a   :  { %v96_v32 = vstv %s259_s23 }
  0x1b   :  { %v104_v33 = vstv %s263_s24 }
  0x1c   :  { %v112_v42 = vstv %s268_s25 }
  0x1d   :  { %v120_v47 = vstv %s270_s26 }
  0x84   :  { %v36_v5 = vpop.permute.xlu0 %35  ;;  %v43_v6 = vpop.permute.xlu1 %42 }
  0x85   :  { %v40_v7 = vsel %vm39_vm0, 4, %v36_v5  ;;  %v47_v8 = vsel %vm46_vm1, 4, %v43_v6 }
  0x86   :  { %v49_v9 = vshll.u32 %v40_v7, 3  ;;  %v53_v10 = vshll.u32 %v47_v8, 6 }
  0x88   :  { %v51_v11 = vor.u32 %v169_v1, %v49_v9  ;;  %v38_v12 = vpop.permute.xlu0 %37  ;;  %v45_v13 = vpop.permute.xlu1 %44 }
  0x89   :  { %v41_v14 = vsel %vm39_vm0, 4, %v38_v12  ;;  %v48_v15 = vsel %vm46_vm1, 4, %v45_v13 }
  0x8a   :  { %v55_v16 = vor.u32 %v53_v10, %v51_v11  ;;  %v50_v17 = vshll.u32 %v41_v14, 3  ;;  %v54_v18 = vshll.u32 %v48_v15, 6 }
  0x8c   :  { %v57_v20 = vand.u32 7, %v55_v16  ;;  %v52_v21 = vor.u32 %v170_v2, %v50_v17  ;;  %v75_v23 = vand.u32 63, %v55_v16  ;;  %vm101_vm10 = vcmp.eq.s32.totalorder %v55_v16, 16 }
  0x8d   :  { %vm109_vm12 = vcmp.eq.s32.totalorder %v55_v16, 195  ;;  %v105_v46 = vsel %vm101_vm10, %v104_v33, 0.0  ;;  %vm117_vm14 = vcmp.eq.s32.totalorder %v55_v16, 82 }
  0x8e   :  { %v56_v25 = vor.u32 %v54_v18, %v52_v21  ;;  %vm59_vm2 = vcmp.eq.s32.totalorder %v57_v20, 0  ;;  %vm67_vm3 = vcmp.eq.s32.totalorder %v57_v20, 3  ;;  %vm77_vm4 = vcmp.eq.s32.totalorder %v75_v23, 8 }
  0x8f   :  { %v63_v26 = vsel %vm59_vm2, %v62_v19, 0.0  ;;  %v71_v27 = vsel %vm67_vm3, %v70_v22, 0.0  ;;  %vm85_vm5 = vcmp.eq.s32.totalorder %v75_v23, 26  ;;  %v81_v31 = vsel %vm77_vm4, %v80_v24, 0.0 }
  0x90   :  { %v58_v28 = vand.u32 7, %v56_v25  ;;  %v73_v29 = vadd.f32 %v71_v27, %v63_v26  ;;  %v76_v34 = vand.u32 63, %v56_v25  ;;  %vm93_vm6 = vcmp.eq.s32.totalorder %v75_v23, 9 }
  0x91   :  { %v89_v36 = vsel %vm85_vm5, %v88_v30, 0.0  ;;  %v97_v41 = vsel %vm93_vm6, %v96_v32, 0.0  ;;  %vm102_vm15 = vcmp.eq.s32.totalorder %v56_v25, 16  ;;  %v113_v51 = vsel %vm109_vm12, %v112_v42, 0.0 }
  0x92   :  { %v83_v35 = vadd.f32 %v81_v31, %v73_v29  ;;  %vm60_vm7 = vcmp.eq.s32.totalorder %v58_v28, 0  ;;  %vm68_vm8 = vcmp.eq.s32.totalorder %v58_v28, 3  ;;  %vm78_vm9 = vcmp.eq.s32.totalorder %v76_v34, 8 }
  0x93   :  { %v64_v37 = vsel %vm60_vm7, %v62_v19, 0.0  ;;  %v72_v38 = vsel %vm68_vm8, %v70_v22, 0.0  ;;  %vm86_vm11 = vcmp.eq.s32.totalorder %v76_v34, 26  ;;  %v82_v43 = vsel %vm78_vm9, %v80_v24, 0.0 }
  0x94   :  { %v91_v39 = vadd.f32 %v89_v36, %v83_v35  ;;  %v74_v40 = vadd.f32 %v72_v38, %v64_v37  ;;  %vm94_vm13 = vcmp.eq.s32.totalorder %v76_v34, 9  ;;  %v90_v48 = vsel %vm86_vm11, %v88_v30, 0.0 }
  0x95   :  { %v98_v52 = vsel %vm94_vm13, %v96_v32, 0.0  ;;  %vm110_vm0 = vcmp.eq.s32.totalorder %v56_v25, 195  ;;  %v121_v55 = vsel %vm117_vm14, %v120_v47, 0.0  ;;  %v106_v56 = vsel %vm102_vm15, %v104_v33, 0.0 }
  0x96   :  { %v99_v44 = vadd.f32 %v97_v41, %v91_v39  ;;  %v84_v45 = vadd.f32 %v82_v43, %v74_v40  ;;  %vm118_vm1 = vcmp.eq.s32.totalorder %v56_v25, 82  ;;  %v114_v59 = vsel %vm110_vm0, %v112_v42, 0.0 }
  0x97   :  { %v122_v61 = vsel %vm118_vm1, %v120_v47, 0.0 }
  0x98   :  { %v107_v49 = vadd.f32 %v105_v46, %v99_v44  ;;  %v92_v50 = vadd.f32 %v90_v48, %v84_v45 }
  0x9a   :  { %v115_v53 = vadd.f32 %v113_v51, %v107_v49  ;;  %v100_v54 = vadd.f32 %v98_v52, %v92_v50 }
  0x9c   :  { %v123_v57 = vadd.f32 %v121_v55, %v115_v53  ;;  %v108_v58 = vadd.f32 %v106_v56, %v100_v54 }
  0x9e   :  { %125 = vadd.xlane.f32.xlu0 %v123_v57  ;;  %v116_v60 = vadd.f32 %v114_v59, %v108_v58 }
  0xa0   :  { %v124_v62 = vadd.f32 %v122_v61, %v116_v60 }
  0xa2   :  { %127 = vadd.xlane.f32.xlu1 %v124_v62 }
 0x127   :  { %v126_v63 = vpop.xlane.xlu0 %125 }
 0x128   :  { %vm129_vm2 = vcmp.gt.f32.partialorder %v126_v63, 0.0 }
 0x129   :  { %v131_v0 = vsel %vm129_vm2, %v126_v63, 1.0 }
 0x12a   :  { %177 = vrcp.f32 %v131_v0 }
 0x12b   :  { %v128_v1 = vpop.xlane.xlu1 %127 }
 0x12c   :  { %vm130_vm3 = vcmp.gt.f32.partialorder %v128_v1, 0.0 }
 0x12d   :  { %v132_v2 = vsel %vm130_vm3, %v128_v1, 1.0 }
 0x12e   :  { %179 = vrcp.f32 %v132_v2 }
 0x137   :  { %v178_v4 = vpop.eup %177 }
 0x138   :  { %v136_v5 = vmul.f32 %v178_v4, %v134_v3 }
 0x13a   :  { %v139_v6 = vmul.f32 %v136_v5, %v123_v57 }
 0x13b   :  { %v180_v7 = vpop.eup %179 }
 0x13c   :  { %v138_v8 = vmul.f32 %v180_v7, %v134_v3  ;;  %141 = vst [vmem:[#allocation6] sm:$0xff] %v139_v6 }
 0x13e   :  { %v140_v9 = vmul.f32 %v138_v8, %v124_v62 }
 0x140   :  { %142 = vst [vmem:[#allocation6 + $0x8] sm:$0xff] %v140_v9 }
 0x141   :  { %204 = shalt.err (!%p201_p9)
}
 0x142   :  { %s221_s5 = smov 128   ;;  %s222_s2 = smov 8  }
 0x143   :  { %154 = dma.vmem_to_hbm [thread:$0]  %s149_s30, 256, %s286_s3, [#allocation4], %s221_s5, %s221_s5, %s222_s2  }
 0x144   :  { %215 = dma.done.wait [#allocation4], 256  }
 0x145   :  { %216 = vsyncadd [#allocation4], 4294967040 }
 0x146   :  { %158 = vsyncpa [#allocation4], 1 }
 0x147   :  { %159 = vsyncpa [#allocation5], 1 }

</bundles_post_ra>
